<compile_context>
chip_gen: v7x
topology: tpu7x:2x2x1
jax: 0.10.0
libtpu: 0.0.40
codegen_flags: <defaults>
</compile_context>

<pallas_src>
import functools
import math

import jax
import jax.numpy as jnp
from jax import lax
from jax.experimental import pallas as pl
from jax.experimental.pallas import tpu as pltpu


_LANES = 128   # lane width of the flattened 2-D view (one vreg of lanes)
_GROUP = 32    # rows per inner-loop group: (32, 128) f32 == 4 vregs per temporary


def _round_up(x, m):
    return -(-x // m) * m


def _round_down(x, m):
    return (x // m) * m


def _chip_params():
    """Returns (num_splits, max_tile_rows, vmem_limit_bytes), generation-aware."""
    vmem_cap = 128 * 1024 * 1024
    try:
        vmem_cap = int(pltpu.get_tpu_info().vmem_capacity_bytes)
    except Exception:
        pass
    if vmem_cap <= 64 * 1024 * 1024:
        # v7x-like: 64 MiB VMEM per TC, 2 TensorCores -> smaller tiles, 2-way split.
        # TODO(synk): if profiling shows one TC idle, switch the leading grid axis
        # to pltpu.CORE_PARALLEL (or pl.core_map over create_tensorcore_mesh).
        return 2, 4096, 32 * 1024 * 1024
    # v5e / v6e: 128 MiB VMEM, single TensorCore -> large streaming tiles.
    return 1, 8192, 48 * 1024 * 1024


def _varifocal_kernel(pred_ref, gt_ref, label_ref, out_ref, *, gamma, alpha,
                      rows, tile_rows, tiles_per_split, need_mask, unroll):
    p = pl.program_id(0)
    i = pl.program_id(1)

    @pl.when(i == 0)
    def _():
        out_ref[...] = jnp.zeros_like(out_ref)

    base_row = (p * tiles_per_split + i) * tile_rows
    lanes = out_ref.shape[-1]
    alpha_f = jnp.float32(alpha)

    def group_body(g, acc):
        r0 = pl.multiple_of(g * _GROUP, _GROUP)
        x = pred_ref[pl.ds(r0, _GROUP), :].astype(jnp.float32)      # logits
        z = gt_ref[pl.ds(r0, _GROUP), :].astype(jnp.float32)        # gt scores
        lbl = label_ref[pl.ds(r0, _GROUP), :].astype(jnp.float32)   # labels (0/1)

        # One exponential shared between sigmoid and the stable BCE log1p term.
        e = jnp.exp(-jnp.abs(x))                  # exp(-|x|)
        inv = 1.0 / (1.0 + e)                     # exact divide (see header note)
        sig = jnp.where(x >= 0.0, inv, e * inv)   # sigmoid(x)

        if float(gamma) == 2.0:
            sig_pow = sig * sig                   # VPU multiply, no EUP pow
        else:
            sig_pow = jnp.power(sig, jnp.float32(gamma))

        # weight = alpha*sig^g*(1-lbl) + z*lbl, reassociated to save a multiply.
        a = alpha_f * sig_pow
        weight = a + lbl * (z - a)

        # Numerically stable BCE-with-logits (reduction='none'):
        #   bce = max(x, 0) - x*z + log1p(exp(-|x|))
        bce = jnp.maximum(x, 0.0) - x * z + jnp.log1p(e)
        prod = bce * weight                       # (GROUP, lanes)

        if need_mask:
            row = base_row + r0 + lax.broadcasted_iota(jnp.int32, (_GROUP, 1), 0)
            prod = jnp.where(row < rows, prod, 0.0)

        # Collapse the (GROUP, lanes) product onto the vreg-shaped (8, lanes) carry
        # with pure VPU adds; the cross-lane reduction happens once in the wrapper.
        return acc + prod.reshape(_GROUP // 8, 8, lanes).sum(axis=0)

    acc = lax.fori_loop(0, tile_rows // _GROUP, group_body,
                        jnp.zeros((8, lanes), jnp.float32), unroll=unroll)
    out_ref[...] += acc


def varifocal_loss(pred_score, gt_score, label, gamma=2.0, alpha=0.75):
    """pred_score, gt_score, label: (B, N, C), any float/int dtype. Scalar f32 loss."""
    assert pred_score.shape == gt_score.shape == label.shape
    mean_axis_size = pred_score.shape[1]          # mean over axis 1 == sum / N
    total = int(pred_score.size)

    num_splits, max_tile_rows, vmem_limit = _chip_params()
    W = _LANES

    pred_f = pred_score.reshape(-1)
    gt_f = gt_score.reshape(-1)
    lbl_f = label.reshape(-1)

    if total % W == 0 and total // W >= _GROUP:
        rows = total // W                         # free reshape: no copies, no casts
    else:
        # Rare fallback (tiny input or B*N*C % 128 != 0): tail-pad with
        # pred=0, gt=0, label=1  ->  weight == 0 exactly (no loss bias).
        padded = _round_up(max(total, 1), W * _GROUP)
        pad = padded - total
        pred_f = jnp.pad(pred_f, (0, pad))
        gt_f = jnp.pad(gt_f, (0, pad))
        lbl_f = jnp.pad(lbl_f, (0, pad), constant_values=1)
        rows = padded // W

    pred2d = pred_f.reshape(rows, W)
    gt2d = gt_f.reshape(rows, W)
    lbl2d = lbl_f.reshape(rows, W)

    rows_per_split = -(-rows // num_splits)
    tile_rows = min(max_tile_rows,
                    _round_up(rows_per_split, _GROUP),
                    _round_down(rows, _GROUP))
    tiles_per_split = -(-rows_per_split // tile_rows)
    num_blocks = -(-rows // tile_rows)            # valid block indices: [0, num_blocks)
    grid_rows = num_splits * tiles_per_split * tile_rows
    need_mask = grid_rows > rows                  # grid overhang / partial last block

    groups = tile_rows // _GROUP
    unroll = True if groups <= 8 else math.gcd(groups, 8)

    kernel = functools.partial(
        _varifocal_kernel, gamma=gamma, alpha=alpha, rows=rows,
        tile_rows=tile_rows, tiles_per_split=tiles_per_split,
        need_mask=need_mask, unroll=unroll)

    last_block = num_blocks - 1

    def in_map(p, i):
        # Clamp so a fully-out-of-range logical tile re-reads the last valid block
        # instead of running off the array; the kernel row-mask zeroes its output.
        return (jnp.minimum(p * tiles_per_split + i, last_block), 0)

    partials = pl.pallas_call(
        kernel,
        out_shape=jax.ShapeDtypeStruct((num_splits * 8, W), jnp.float32),
        grid=(num_splits, tiles_per_split),
        in_specs=[
            pl.BlockSpec((tile_rows, W), in_map),
            pl.BlockSpec((tile_rows, W), in_map),
            pl.BlockSpec((tile_rows, W), in_map),
        ],
        out_specs=pl.BlockSpec((8, W), lambda p, i: (p, 0)),
        compiler_params=pltpu.CompilerParams(
            dimension_semantics=("parallel", "arbitrary"),
            vmem_limit_bytes=vmem_limit,
        ),
    )(pred2d, gt2d, lbl2d)

    # Tiny (num_splits*8, 128) cross-lane reduction + mean-axis division in XLA.
    return jnp.sum(partials) / jnp.float32(mean_axis_size)


def varifocal_loss_ref(pred_score, gt_score, label, gamma=2.0, alpha=0.75):
    """Pure-JAX reference mirroring the PyTorch module."""
    pred_score = pred_score.astype(jnp.float32)
    gt_score = gt_score.astype(jnp.float32)
    label = label.astype(jnp.float32)
    weight = (alpha * jax.nn.sigmoid(pred_score) ** gamma * (1.0 - label)
              + gt_score * label)
    bce = (jnp.maximum(pred_score, 0.0)
           - pred_score * gt_score
           + jnp.log1p(jnp.exp(-jnp.abs(pred_score))))
    return jnp.sum(jnp.mean(bce * weight, axis=1))


if __name__ == "__main__":
    key = jax.random.PRNGKey(0)

    def make_case(k, B, N, C):
        k1, k2, k3 = jax.random.split(k, 3)
        pred = jax.random.normal(k1, (B, N, C), dtype=jnp.float32) * 2.0
        gt = jax.random.uniform(k2, (B, N, C), dtype=jnp.float32)
        lbl = (jax.random.uniform(k3, (B, N, C)) > 0.7).astype(jnp.float32)
        return pred, gt, lbl

    k1, k2 = jax.random.split(key)
    cases = [
        make_case(k1, 2, 40, 64),   # lane-aligned -> zero-copy fast path + row mask
        make_case(k2, 2, 8, 16),    # tiny / unaligned -> tail-pad fallback path
    ]

    loss_fn = jax.jit(varifocal_loss)
    for pred, gt, lbl in cases:
        out = jax.block_until_ready(loss_fn(pred, gt, lbl))
        ref = varifocal_loss_ref(pred, gt, lbl)
        assert jnp.allclose(out, ref, rtol=1e-4, atol=1e-5), (out, ref)

    print("KERNEL_OK")
</pallas_src>

<mosaic_0001>
module attributes {stable_mosaic.version = 11 : i64} {
  func.func @_varifocal_kernel(%arg0: i32, %arg1: i32, %arg2: memref<32x128xf32, #tpu.memory_space<vmem>>, %arg3: memref<32x128xf32, #tpu.memory_space<vmem>>, %arg4: memref<32x128xf32, #tpu.memory_space<vmem>>, %arg5: memref<8x128xf32, #tpu.memory_space<vmem>>) attributes {dimension_semantics = [#tpu.dimension_semantics<parallel>, #tpu.dimension_semantics<arbitrary>], iteration_bounds = array<i64: 1, 2>, scalar_prefetch = 0 : i64, scratch_operands = 0 : i64, tpu.core_type = #tpu.core_type<tc>, window_params = [{transform_indices = @transform_0, window_bounds = array<i64: 32, 128>}, {transform_indices = @transform_1, window_bounds = array<i64: 32, 128>}, {transform_indices = @transform_2, window_bounds = array<i64: 32, 128>}, {transform_indices = @transform_3, window_bounds = array<i64: 8, 128>}]} {
    %c0_i32 = arith.constant 0 : i32
    %0 = arith.cmpi eq, %arg1, %c0_i32 : i32
    %1 = arith.extui %0 : i1 to i32
    %c0_i32_0 = arith.constant 0 : i32
    %2 = arith.cmpi ne, %1, %c0_i32_0 : i32
    scf.if %2 {
      %cst_17 = arith.constant 0.000000e+00 : f32
      %56 = vector.broadcast %cst_17 : f32 to vector<8x128xf32>
      %c0_18 = arith.constant 0 : index
      %c0_19 = arith.constant 0 : index
      %57 = vector.load %arg5[%c0_18, %c0_19] : memref<8x128xf32, #tpu.memory_space<vmem>>, vector<8x128xf32>
      tpu.vector_store %arg5[%c0_18, %c0_19], %56 {strides = array<i32>} : memref<8x128xf32, #tpu.memory_space<vmem>>, vector<8x128xf32>,
    } else {
    }
    %c2_i32 = arith.constant 2 : i32
    %3 = arith.muli %arg0, %c2_i32 : i32
    %4 = arith.addi %3, %arg1 : i32
    %c32_i32 = arith.constant 32 : i32
    %5 = arith.muli %4, %c32_i32 : i32
    %cst = arith.constant 0.000000e+00 : f32
    %6 = vector.broadcast %cst : f32 to vector<8x128xf32>
    %cst_1 = arith.constant 7.500000e-01 : f32
    %c0_i32_2 = arith.constant 0 : i32
    %c32_i32_3 = arith.constant 32 : i32
    %7 = arith.muli %c0_i32_2, %c32_i32_3 : i32
    %8 = tpu.assume_multiple %7, 32 : i32
    %9 = arith.index_cast %8 : i32 to index
    %c0 = arith.constant 0 : index
    %10 = vector.load %arg2[%9, %c0] : memref<32x128xf32, #tpu.memory_space<vmem>>, vector<32x128xf32>
    %11 = arith.index_cast %8 : i32 to index
    %c0_4 = arith.constant 0 : index
    %12 = vector.load %arg3[%11, %c0_4] : memref<32x128xf32, #tpu.memory_space<vmem>>, vector<32x128xf32>
    %13 = arith.index_cast %8 : i32 to index
    %c0_5 = arith.constant 0 : index
    %14 = vector.load %arg4[%13, %c0_5] : memref<32x128xf32, #tpu.memory_space<vmem>>, vector<32x128xf32>
    %15 = math.absf %10 : vector<32x128xf32>
    %cst_6 = arith.constant 0.000000e+00 : f32
    %16 = vector.broadcast %cst_6 : f32 to vector<32x128xf32>
    %17 = arith.subf %16, %15 : vector<32x128xf32>
    %18 = math.exp %17 : vector<32x128xf32>
    %cst_7 = arith.constant 1.000000e+00 : f32
    %19 = vector.broadcast %cst_7 : f32 to vector<32x128xf32>
    %20 = arith.addf %19, %18 : vector<32x128xf32>
    %cst_8 = arith.constant 1.000000e+00 : f32
    %21 = vector.broadcast %cst_8 : f32 to vector<32x128xf32>
    %22 = arith.divf %21, %20 : vector<32x128xf32>
    %cst_9 = arith.constant 0.000000e+00 : f32
    %23 = vector.broadcast %cst_9 : f32 to vector<32x128xf32>
    %24 = arith.cmpf oge, %10, %23 : vector<32x128xf32>
    %25 = arith.mulf %18, %22 : vector<32x128xf32>
    %26 = arith.select %24, %22, %25 : vector<32x128xi1>, vector<32x128xf32>
    %27 = arith.mulf %26, %26 : vector<32x128xf32>
    %28 = vector.broadcast %cst_1 : f32 to vector<32x128xf32>
    %29 = arith.mulf %28, %27 : vector<32x128xf32>
    %30 = arith.subf %12, %29 : vector<32x128xf32>
    %31 = arith.mulf %14, %30 : vector<32x128xf32>
    %32 = arith.addf %29, %31 : vector<32x128xf32>
    %cst_10 = arith.constant 0.000000e+00 : f32
    %33 = vector.broadcast %cst_10 : f32 to vector<32x128xf32>
    %34 = arith.maximumf %10, %33 : vector<32x128xf32>
    %35 = arith.mulf %10, %12 : vector<32x128xf32>
    %36 = arith.subf %34, %35 : vector<32x128xf32>
    %37 = math.log1p %18 : vector<32x128xf32>
    %38 = arith.addf %36, %37 : vector<32x128xf32>
    %39 = arith.mulf %38, %32 : vector<32x128xf32>
    %40 = arith.addi %5, %8 : i32
    %41 = tpu.iota {dimensions = array<i32: 0>} : vector<32x1xi32>
    %42 = vector.broadcast %40 : i32 to vector<32x1xi32>
    %43 = arith.addi %42, %41 : vector<32x1xi32>
    %c40_i32 = arith.constant 40 : i32
    %44 = vector.broadcast %c40_i32 : i32 to vector<32x1xi32>
    %45 = arith.cmpi slt, %43, %44 : vector<32x1xi32>
    %cst_11 = arith.constant 0.000000e+00 : f32
    %46 = vector.shape_cast %45 : vector<32x1xi1> to vector<32x1xi1>
    %47 = vector.broadcast %46 : vector<32x1xi1> to vector<32x128xi1>
    %48 = vector.broadcast %cst_11 : f32 to vector<32x128xf32>
    %49 = arith.select %47, %39, %48 : vector<32x128xi1>, vector<32x128xf32>
    %50 = vector.shape_cast %49 : vector<32x128xf32> to vector<4x8x128xf32>
    %cst_12 = arith.constant dense<0.000000e+00> : vector<8x128xf32>
    %51 = vector.multi_reduction <add>, %50, %cst_12 [0] : vector<4x8x128xf32> to vector<8x128xf32>
    %52 = arith.addf %6, %51 : vector<8x128xf32>
    %c1_i32 = arith.constant 1 : i32
    %c0_13 = arith.constant 0 : index
    %c0_14 = arith.constant 0 : index
    %53 = vector.load %arg5[%c0_13, %c0_14] : memref<8x128xf32, #tpu.memory_space<vmem>>, vector<8x128xf32>
    %54 = arith.addf %53, %52 : vector<8x128xf32>
    %c0_15 = arith.constant 0 : index
    %c0_16 = arith.constant 0 : index
    %55 = vector.load %arg5[%c0_15, %c0_16] : memref<8x128xf32, #tpu.memory_space<vmem>>, vector<8x128xf32>
    tpu.vector_store %arg5[%c0_15, %c0_16], %54 {strides = array<i32>} : memref<8x128xf32, #tpu.memory_space<vmem>>, vector<8x128xf32>,
    return
  }
  func.func @transform_0(%arg0: i32, %arg1: i32) -> (i32, i32) {
    %c2_i32 = arith.constant 2 : i32
    %0 = arith.muli %arg0, %c2_i32 : i32
    %1 = arith.addi %0, %arg1 : i32
    %c1_i32 = arith.constant 1 : i32
    %2 = arith.minsi %1, %c1_i32 : i32
    %c0_i32 = arith.constant 0 : i32
    %c0_i32_0 = arith.constant 0 : i32
    return %2, %c0_i32 : i32, i32
  }
  func.func @transform_1(%arg0: i32, %arg1: i32) -> (i32, i32) {
    %c2_i32 = arith.constant 2 : i32
    %0 = arith.muli %arg0, %c2_i32 : i32
    %1 = arith.addi %0, %arg1 : i32
    %c1_i32 = arith.constant 1 : i32
    %2 = arith.minsi %1, %c1_i32 : i32
    %c0_i32 = arith.constant 0 : i32
    %c0_i32_0 = arith.constant 0 : i32
    return %2, %c0_i32 : i32, i32
  }
  func.func @transform_2(%arg0: i32, %arg1: i32) -> (i32, i32) {
    %c2_i32 = arith.constant 2 : i32
    %0 = arith.muli %arg0, %c2_i32 : i32
    %1 = arith.addi %0, %arg1 : i32
    %c1_i32 = arith.constant 1 : i32
    %2 = arith.minsi %1, %c1_i32 : i32
    %c0_i32 = arith.constant 0 : i32
    %c0_i32_0 = arith.constant 0 : i32
    return %2, %c0_i32 : i32, i32
  }
  func.func @transform_3(%arg0: i32, %arg1: i32) -> (i32, i32) {
    %c0_i32 = arith.constant 0 : i32
    %c0_i32_0 = arith.constant 0 : i32
    return %arg0, %c0_i32 : i32, i32
  }
}

</mosaic_0001>

<bundles_post_ra>
// kernel: varifocal_loss.1
= control target key start
LH: loop header
LB: loop body
LE: loop exit
PB: predicated region body
PF: predicated region fallthrough
CT: control target
= control target key end

     0   :  { %s733_s12 = smov 0   ;;  %s735_s13 = smov 0   ;;  %s910_s0 = inlined_call_operand.vmem [shape: f32[40,128], index: 0, kind: input, shape index: {}]   ;;  %s911_s1 = inlined_call_operand.vmem [shape: f32[40,128], index: 1, kind: input, shape index: {}]   ;;  %s912_s2 = inlined_call_operand.vmem [shape: f32[40,128], index: 2, kind: input, shape index: {}]   ;;  %s913_s3 = inlined_call_operand.vmem [shape: f32[8,128], index: 3, kind: output, shape index: {}]  }
   0x1   :  { %s737_s14 = smov 0  }
   0x2 LB: > { %s22_s15 = sadd.s32 1, %s706_s13  ;;  %p627_p0 = scmp.ge.s32.totalorder %s710_s14, 1  ;;  %s710_s14 = sphi %s737_s14, %s13_s14   ;;  %s706_s13 = sphi %s735_s13, %s923_s13   ;;  %s702_s12 = sphi %s733_s12, %s922_s12  }
   0x3   : > { %p23_p1 = scmp.ge.s32.totalorder %s22_s15, 2  ;;  %p244_p2 = scmp.lt.s32.totalorder %s710_s14, 3 }
   0x5   : > { %s925_s15 = smov (%p23_p1, %s22_s15), 0  ;;  %p245_p3 = pnand %p627_p0, %p244_p2 }
   0x6   : > { %p303_p4 = scmp.lt.s32.totalorder (!%p245_p3), %s702_s12, 1  ;;  %p634_p6 = scmp.ne.s32.totalorder (!%p245_p3), %s702_s12, 0 }
   0x7   : > { %248 = sbr.rel (%p245_p3) target bundleno = 80 (0x50), region = 32 }
   0xe   : > { %s304_s16 = scalar_select %p303_p4, %s702_s12, 1 }
   0xf   : > { %v712_v0 = vmov (!%p634_p6), 0.0  }
  0x10   : > { %s628_s17 = sshll.u32 %s304_s16, 2  ;;  %374 = sbr.rel (%p634_p6) target bundleno = 23 (0x17), region = 36  ;;  %375 = vst [vmem:[%s913_s3] sm:$0xff] (!%p634_p6), %v712_v0 }
  0x11   : > { %p310_p5 = scmp.lt.s32.totalorder %s628_s17, 4 }
  0x13   : > { %s927_s17 = smov (!%p310_p5, %s628_s17), 4 }
  0x14   : > { %s629_s18 = sshll.u32 %s927_s17, 3 }
  0x15   : > { %s313_s21 = scalar_lea.vmem %s910_s0, %s629_s18  ;;  %s761_s24 = scalar_lea.vmem %s911_s1, %s629_s18 }
  0x16   : > { %s766_s27 = scalar_lea.vmem %s912_s2, %s629_s18 }
  0x17 PF: > { %v772_v1 = vld [vmem:[%s313_s21] sm:$0xff]  ;;  %v774_v2 = vld [vmem:[%s313_s21 + $0x8] sm:$0xff]  ;;  %v776_v3 = vld [vmem:[%s313_s21 + $0x10] sm:$0xff]  ;;  %s635_s30 = sshll.u32 %s702_s12, 5  ;;  %v508_v29 = vlaneseq }
  0x18   : > { %v778_v4 = vld [vmem:[%s313_s21 + $0x18] sm:$0xff]  ;;  %v391_v5 = vand.u32 2147483647, %v772_v1  ;;  %v392_v6 = vand.u32 2147483647, %v774_v2  ;;  %v790_v21 = vld [vmem:[%s761_s24] sm:$0xff]  ;;  %v811_v32 = vstv %s635_s30 }
  0x19   : > { %v393_v7 = vand.u32 2147483647, %v776_v3  ;;  %v394_v9 = vand.u32 2147483647, %v778_v4  ;;  %v793_v22 = vld [vmem:[%s761_s24 + $0x8] sm:$0xff]  ;;  %v799_v25 = vld [vmem:[%s761_s24 + $0x10] sm:$0xff]  ;;  %v455_v30 = vmul.f32 %v790_v21, %v772_v1 }
  0x1a   : > { %v395_v8 = vsub.f32 0.0, %v391_v5  ;;  %v396_v10 = vsub.f32 0.0, %v392_v6  ;;  %v802_v26 = vld [vmem:[%s761_s24 + $0x18] sm:$0xff]  ;;  %vm419_vm0 = vcmp.ge.f32.partialorder %v772_v1, 0.0  ;;  %v456_v31 = vmul.f32 %v793_v22, %v774_v2 }
  0x1b   : > { %v397_v11 = vsub.f32 0.0, %v393_v7  ;;  %v398_v13 = vsub.f32 0.0, %v394_v9  ;;  %vm420_vm1 = vcmp.ge.f32.partialorder %v774_v2, 0.0  ;;  %v451_v33 = vmax.f32 %v772_v1, 0.0 }
  0x1c   : > { %v399_v12 = vmul.f32 1.442695, %v395_v8  ;;  %v401_v14 = vmul.f32 1.442695, %v396_v10  ;;  %v457_v34 = vmul.f32 %v799_v25, %v776_v3  ;;  %v458_v35 = vmul.f32 %v802_v26, %v778_v4 }
  0x1d   : > { %v403_v15 = vmul.f32 1.442695, %v397_v11  ;;  %v405_v16 = vmul.f32 1.442695, %v398_v13  ;;  %v452_v36 = vmax.f32 %v774_v2, 0.0  ;;  %vm421_vm2 = vcmp.ge.f32.partialorder %v776_v3, 0.0 }
  0x1e   : > { %664 = vpow2.f32 %v399_v12  ;;  %v453_v39 = vmax.f32 %v776_v3, 0.0  ;;  %v454_v40 = vmax.f32 %v778_v4, 0.0  ;;  %vm422_vm3 = vcmp.ge.f32.partialorder %v778_v4, 0.0 }
  0x1f   : > { %666 = vpow2.f32 %v401_v14  ;;  %v509_v42 = vshrl.u32 %v508_v29, 7  ;;  %v826_v43 = vsub.f32 %v451_v33, %v455_v30  ;;  %v829_v46 = vsub.f32 %v452_v36, %v456_v31 }
  0x20   : > { %668 = vpow2.f32 %v403_v15  ;;  %v832_v50 = vsub.f32 %v453_v39, %v457_v34  ;;  %v834_v51 = vsub.f32 %v454_v40, %v458_v35 }
  0x21   : > { %670 = vpow2.f32 %v405_v16  ;;  %v510_v56 = vadd.s32 8, %v509_v42  ;;  %v511_v57 = vadd.s32 16, %v509_v42  ;;  %v512_v58 = vadd.s32 24, %v509_v42 }
  0x22   : > { %v843_v63 = vadd.s32 %v811_v32, %v509_v42 }
  0x24   : > { %vm518_vm8 = vcmp.lt.s32.totalorder %v843_v63, 40 }
  0x28   : > { %v665_v17 = vpop.eup %664 }
  0x29   : > { %v784_v18 = vpop.eup %666  ;;  %v407_v19 = vadd.f32 1.0, %v665_v17  ;;  %v466_v37 = vmul.f32 -0.5, %v665_v17  ;;  %v469_v44 = vand.u32 2147483647, %v665_v17 }
  0x2a   : > { %v786_v20 = vpop.eup %668  ;;  %v408_v23 = vadd.f32 1.0, %v784_v18  ;;  %v475_v38 = vmul.f32 -0.5, %v784_v18  ;;  %v478_v49 = vand.u32 2147483647, %v784_v18 }
  0x2b   : > { %v796_v24 = vpop.eup %670  ;;  %v409_v27 = vadd.f32 1.0, %v786_v20  ;;  %672 = vrcp.f32 %v407_v19  ;;  %v484_v41 = vmul.f32 -0.5, %v786_v20  ;;  %v467_v47 = vadd.f32 1.0, %v466_v37 }
  0x2c   : > { %v410_v28 = vadd.f32 1.0, %v796_v24  ;;  %674 = vrcp.f32 %v408_v23  ;;  %v493_v45 = vmul.f32 -0.5, %v796_v24  ;;  %v476_v48 = vadd.f32 1.0, %v475_v38  ;;  %v388_v38 = vld [vmem:[%s766_s27 + $0x8] sm:$0xff] }
  0x2d   : > { %676 = vrcp.f32 %v409_v27  ;;  %v487_v52 = vand.u32 2147483647, %v786_v20  ;;  %v496_v53 = vand.u32 2147483647, %v796_v24  ;;  %v485_v55 = vadd.f32 1.0, %v484_v41  ;;  %v389_v41 = vld [vmem:[%s766_s27 + $0x10] sm:$0xff] }
  0x2e   : > { %678 = vrcp.f32 %v410_v28  ;;  %vm838_vm4 = vcmp.lt.f32.partialorder %v469_v44, 0.0004427343  ;;  %v494_v62 = vadd.f32 1.0, %v493_v45  ;;  %v468_v6 = vmul.f32 %v665_v17, %v467_v47 }
  0x2f   : > { %680 = vlog2.f32 %v407_v19  ;;  %v477_v7 = vmul.f32 %v784_v18, %v476_v48  ;;  %vm847_vm5 = vcmp.lt.f32.partialorder %v478_v49, 0.0004427343  ;;  %vm854_vm6 = vcmp.lt.f32.partialorder %v487_v52, 0.0004427343  ;;  %v390_v48 = vld [vmem:[%s766_s27 + $0x18] sm:$0xff] }
  0x30   : > { %682 = vlog2.f32 %v408_v23  ;;  %vm858_vm7 = vcmp.lt.f32.partialorder %v496_v53, 0.0004427343  ;;  %v515_v47 = vadd.s32 %v811_v32, %v510_v56 }
  0x31   : > { %684 = vlog2.f32 %v409_v27 }
  0x32   : > { %686 = vlog2.f32 %v410_v28  ;;  %v495_v28 = vmul.f32 %v796_v24, %v494_v62  ;;  %v517_v62 = vadd.s32 %v811_v32, %v512_v58  ;;  %vm519_vm9 = vcmp.lt.s32.totalorder %v515_v47, 40 }
  0x34   : > { %vm521_vm11 = vcmp.lt.s32.totalorder %v517_v62, 40 }
  0x35   : > { %v673_v54 = vpop.eup %672 }
  0x36   : > { %v675_v59 = vpop.eup %674  ;;  %v423_v60 = vmul.f32 %v673_v54, %v665_v17 }
  0x37   : > { %v677_v0 = vpop.eup %676  ;;  %v424_v5 = vmul.f32 %v675_v59, %v784_v18  ;;  %v486_v18 = vmul.f32 %v786_v20, %v485_v55 }
  0x38   : > { %v679_v9 = vpop.eup %678  ;;  %v425_v10 = vmul.f32 %v677_v0, %v786_v20  ;;  %v427_v11 = vsel %vm419_vm0, %v673_v54, %v423_v60  ;;  %v387_v20 = vld [vmem:[%s766_s27] sm:$0xff] }
  0x39   : > { %v681_v14 = vpop.eup %680  ;;  %v426_v15 = vmul.f32 %v679_v9, %v796_v24  ;;  %v428_v16 = vsel %vm420_vm1, %v675_v59, %v424_v5  ;;  %v431_v17 = vmul.f32 %v427_v11, %v427_v11 }
  0x3a   : > { %v683_v1 = vpop.eup %682  ;;  %v429_v19 = vsel %vm421_vm2, %v677_v0, %v425_v10  ;;  %v432_v23 = vmul.f32 %v428_v16, %v428_v16  ;;  %v465_v27 = vmul.f32 0.6931472, %v681_v14 }
  0x3b   : > { %v685_v29 = vpop.eup %684  ;;  %v430_v30 = vsel %vm422_vm3, %v679_v9, %v426_v15  ;;  %v433_v31 = vmul.f32 %v429_v19, %v429_v19  ;;  %v435_v2 = vmul.f32 0.75, %v431_v17  ;;  %v474_v33 = vmul.f32 0.6931472, %v683_v1 }
  0x3c   : > { %v687_v34 = vpop.eup %686  ;;  %v434_v35 = vmul.f32 %v430_v30, %v430_v30  ;;  %v436_v36 = vmul.f32 0.75, %v432_v23  ;;  %v471_v3 = vsel %vm838_vm4, %v468_v6, %v465_v27  ;;  %v483_v37 = vmul.f32 0.6931472, %v685_v29 }
  0x3d   : > { %v437_v39 = vmul.f32 0.75, %v433_v31  ;;  %v439_v24 = vsub.f32 %v790_v21, %v435_v2  ;;  %v480_v4 = vsel %vm847_vm5, %v477_v7, %v474_v33  ;;  %v492_v40 = vmul.f32 0.6931472, %v687_v34 }
  0x3e   : > { %v438_v42 = vmul.f32 0.75, %v434_v35  ;;  %v440_v44 = vsub.f32 %v793_v22, %v436_v36  ;;  %v489_v45 = vsel %vm854_vm6, %v486_v18, %v483_v37  ;;  %v499_v53 = vadd.f32 %v471_v3, %v826_v43 }
  0x3f   : > { %v441_v49 = vsub.f32 %v799_v25, %v437_v39  ;;  %v443_v52 = vmul.f32 %v439_v24, %v387_v20  ;;  %v498_v21 = vsel %vm858_vm7, %v495_v28, %v492_v40  ;;  %v500_v59 = vadd.f32 %v480_v4, %v829_v46 }
  0x40   : > { %v442_v54 = vsub.f32 %v802_v26, %v438_v42  ;;  %v444_v55 = vmul.f32 %v440_v44, %v388_v38  ;;  %v516_v22 = vadd.s32 %v811_v32, %v511_v57  ;;  %v501_v56 = vadd.f32 %v489_v45, %v832_v50 }
  0x41   : > { %v445_v60 = vmul.f32 %v441_v49, %v389_v41  ;;  %v447_v61 = vadd.f32 %v443_v52, %v435_v2  ;;  %v502_v5 = vadd.f32 %v498_v21, %v834_v51  ;;  %v538_v51 = vld [vmem:[%s913_s3] sm:$0xff] }
  0x42   : > { %v446_v25 = vmul.f32 %v442_v54, %v390_v48  ;;  %v448_v0 = vadd.f32 %v444_v55, %v436_v36  ;;  %vm520_vm10 = vcmp.lt.s32.totalorder %v516_v22, 40 }
  0x43   : > { %v449_v43 = vadd.f32 %v445_v60, %v437_v39  ;;  %v503_v6 = vmul.f32 %v499_v53, %v447_v61 }
  0x44   : > { %v450_v26 = vadd.f32 %v446_v25, %v438_v42  ;;  %v504_v7 = vmul.f32 %v500_v59, %v448_v0 }
  0x45   : > { %v505_v46 = vmul.f32 %v501_v56, %v449_v43  ;;  %v530_v57 = vsel %vm518_vm8, %v503_v6, 0.0 }
  0x46   : > { %v506_v8 = vmul.f32 %v502_v5, %v450_v26  ;;  %v531_v9 = vsel %vm519_vm9, %v504_v7, 0.0 }
  0x47   : > { %v532_v50 = vsel %vm520_vm10, %v505_v46, 0.0  ;;  %v534_v10 = vadd.f32 %v531_v9, %v530_v57 }
  0x48   : > { %v533_v32 = vsel %vm521_vm11, %v506_v8, 0.0 }
  0x49   : > { %v535_v58 = vadd.f32 %v534_v10, %v532_v50 }
  0x4b   : > { %v536_v63 = vadd.f32 %v535_v58, %v533_v32 }
  0x4d   : > { %v539_v11 = vadd.f32 %v538_v51, %v536_v63 }
  0x4f   : > { %540 = vst [vmem:[%s913_s3] sm:$0xff] %v539_v11 }
  0x50 PF: > { %s13_s14 = sadd.s32 1, %s710_s14   ;;  %s922_s12 = smov %s706_s13 }
  0x51   : > { %p10_p7 = scmp.ge.s32.totalorder %s13_s14, 4   ;;  %s923_s13 = smov %s925_s15 }
  0x53   :  { %12 = sbr.rel (!%p10_p7) target bundleno = 2 (0x2), region = 72 }

</bundles_post_ra>
